<compile_context>
chip_gen: v5e
topology: v5e:2x2
jax: 0.10.0
libtpu: 0.0.40
codegen_flags: <defaults>
</compile_context>

<pallas_src>
import jax
import jax.numpy as jnp
from jax import lax
from jax.experimental import pallas as pl
from jax.experimental.pallas import tpu as pltpu

_LANE = 128
_CHUNK_ROWS = 256   # inner-loop chunk: bounds live f32 temporaries (~0.5 MiB)


def _round_up(x, m):
    return (x + m - 1) // m * m


def _sublane_multiple(dtype):
    # Native sublane tiling: 8 for 32-bit, 16 for 16-bit, 32 for 8-bit dtypes.
    return max(8, 32 // jnp.dtype(dtype).itemsize)


def _device_kind():
    try:
        return jax.devices()[0].device_kind.lower()
    except Exception:
        return ""


def _num_tensorcores(kind):
    # Only v7x has 2 TensorCores per chip worth splitting the HBM stream over.
    return 2 if "v7" in kind else 1


def _block_byte_target(kind):
    # Per-input block byte target. Scoped-VMEM defaults: v5e 16 MiB, v6e/v7x
    # 32 MiB -> ~2 MiB blocks on v5e, ~4 MiB on v6e/v7x.
    return (2 << 20) if "v5" in kind else (4 << 20)


def _make_bce_kernel(block_rows, chunk_rows, blocks_per_core, total_rows, inv_n):
    n_chunks = block_rows // chunk_rows
    unroll = n_chunks <= 8

    def kernel(p_ref, t_ref, out_ref, acc_ref):
        c = pl.program_id(0)   # TensorCore split (size 1 except on v7x)
        j = pl.program_id(1)   # reduction sweep over row-blocks

        @pl.when(j == 0)
        def _init():
            acc_ref[...] = jnp.zeros_like(acc_ref)

        gi = c * blocks_per_core + j          # unclamped global block index
        row0 = gi * block_rows
        is_full = row0 + block_rows <= total_rows

        def accumulate(masked):
            def body(k, carry):
                off = pl.multiple_of(k * chunk_rows, chunk_rows)
                # Cast in-kernel (handles bf16 inputs; no wrapper astype pass).
                p = p_ref[pl.ds(off, chunk_rows), :].astype(jnp.float32)
                t = t_ref[pl.ds(off, chunk_rows), :].astype(jnp.float32)
                # PyTorch BCELoss clamps each log term at -100.
                log_p = jnp.maximum(jnp.log(p), -100.0)
                log_1mp = jnp.maximum(jnp.log(1.0 - p), -100.0)
                # pos == -(elementwise BCE); the global negation is folded into
                # the finalize scaling (saves the (1-t) term and one multiply).
                pos = log_1mp + t * (log_p - log_1mp)
                if masked:
                    rid = row0 + off + lax.broadcasted_iota(
                        jnp.int32, (chunk_rows, _LANE), 0)
                    pos = jnp.where(rid < total_rows, pos, 0.0)
                # (chunk_rows,128) -> (8,128): pure VPU adds, no per-step XLU.
                acc_ref[...] += jnp.sum(
                    pos.reshape(chunk_rows // 8, 8, _LANE), axis=0)
                return carry

            lax.fori_loop(0, n_chunks, body, 0, unroll=unroll)

        @pl.when(is_full)
        def _full_block():
            accumulate(False)          # common path: no masking cost

        @pl.when(jnp.logical_not(is_full))
        def _ragged_block():
            accumulate(True)           # only partial / clamped blocks pay it

        @pl.when(j == pl.num_programs(1) - 1)
        def _finalize():
            # Per-core partial mean contribution (negation + 1/n folded here).
            out_ref[0] = acc_ref[...] * (-inv_n)

    return kernel


def _bce_main(p2, t2, inv_n, kind, ncores):
    """Kernel over a lane-dense (rows, 128) view; returns summed, pre-scaled partials."""
    rows = p2.shape[0]
    itembytes = p2.dtype.itemsize + t2.dtype.itemsize
    max_itemsize = max(p2.dtype.itemsize, t2.dtype.itemsize)
    sub = max(_sublane_multiple(p2.dtype), _sublane_multiple(t2.dtype))

    max_block_rows = _block_byte_target(kind) // (_LANE * max_itemsize)
    block_rows = min(max_block_rows, _round_up(rows, sub))
    if block_rows > _CHUNK_ROWS:
        block_rows = _round_up(block_rows, _CHUNK_ROWS)
        chunk_rows = _CHUNK_ROWS
    else:
        chunk_rows = block_rows

    total_blocks = -(-rows // block_rows)
    if total_blocks < ncores:
        ncores = 1                       # too little work to split across TCs
    blocks_per_core = -(-total_blocks // ncores)

    def in_index_map(c, j):
        # Clamp so the DMA never targets a fully out-of-range block; the
        # in-kernel row mask zeroes any re-read contribution.
        return (jnp.minimum(c * blocks_per_core + j, total_blocks - 1), 0)

    if ncores == 2:
        dim_sems = (getattr(pltpu, "CORE_PARALLEL", "parallel"),
                    getattr(pltpu, "ARBITRARY", "arbitrary"))
    else:
        dim_sems = ("arbitrary", "arbitrary")

    # 2 pipeline buffers per input block + headroom for chunk temporaries.
    block_bytes = block_rows * _LANE * itembytes
    vmem_limit = int(min(max(2 * block_bytes + (8 << 20), 16 << 20), 100 << 20))

    n_main = rows * _LANE
    cost = pl.CostEstimate(
        flops=8 * n_main,
        transcendentals=2 * n_main,
        bytes_accessed=n_main * itembytes + ncores * 8 * _LANE * 4,
    )

    out = pl.pallas_call(
        _make_bce_kernel(block_rows, chunk_rows, blocks_per_core, rows, inv_n),
        out_shape=jax.ShapeDtypeStruct((ncores, 8, _LANE), jnp.float32),
        grid_spec=pltpu.PrefetchScalarGridSpec(
            num_scalar_prefetch=0,
            grid=(ncores, blocks_per_core),
            in_specs=[
                pl.BlockSpec((block_rows, _LANE), in_index_map),
                pl.BlockSpec((block_rows, _LANE), in_index_map),
            ],
            out_specs=pl.BlockSpec((1, 8, _LANE), lambda c, j: (c, 0, 0)),
            scratch_shapes=[pltpu.VMEM((8, _LANE), jnp.float32)],
        ),
        compiler_params=pltpu.CompilerParams(
            dimension_semantics=dim_sems,
            vmem_limit_bytes=vmem_limit,
        ),
        cost_estimate=cost,
    )(p2, t2)

    # Tiny (ncores, 8, 128) partial sums; already scaled by -1/n in-kernel.
    return jnp.sum(out)


def binary_cross_entropy_loss_2d(probs, targets):
    """Mean BCE over all elements: nn.BCELoss()(probs.view(-1), targets.view(-1))."""
    assert probs.shape == targets.shape, "probs/targets shape mismatch"
    n = int(probs.size)
    inv_n = 1.0 / n

    kind = _device_kind()
    ncores = _num_tensorcores(kind)

    p_flat = probs.reshape(-1)
    t_flat = targets.reshape(-1)

    main = (n // _LANE) * _LANE
    pieces = []

    if main:
        p2 = p_flat[:main].reshape(main // _LANE, _LANE)
        t2 = t_flat[:main].reshape(main // _LANE, _LANE)
        pieces.append(_bce_main(p2, t2, inv_n, kind, ncores))

    if main != n:
        # <128-element tail handled with plain JAX (no padded full-tensor copy
        # on the rare lane-unaligned path).
        p_tail = p_flat[main:].astype(jnp.float32)
        t_tail = t_flat[main:].astype(jnp.float32)
        log_p = jnp.maximum(jnp.log(p_tail), -100.0)
        log_1mp = jnp.maximum(jnp.log(1.0 - p_tail), -100.0)
        pieces.append(-jnp.sum(log_1mp + t_tail * (log_p - log_1mp)) * inv_n)

    total = pieces[0]
    for extra in pieces[1:]:
        total = total + extra
    return total


def _reference_bce(probs, targets):
    p = probs.reshape(-1).astype(jnp.float32)
    t = targets.reshape(-1).astype(jnp.float32)
    log_p = jnp.maximum(jnp.log(p), -100.0)
    log_1mp = jnp.maximum(jnp.log(1.0 - p), -100.0)
    return jnp.mean(-(t * log_p + (1.0 - t) * log_1mp))


if __name__ == "__main__":
    key = jax.random.PRNGKey(0)
    k1, k2 = jax.random.split(key)

    # NCHW-shaped probability map (module feeds probabilities into BCELoss)
    # and binary targets.
    shape = (2, 4, 16, 16)
    probs = jax.nn.sigmoid(jax.random.normal(k1, shape, dtype=jnp.float32))
    targets = (jax.random.uniform(k2, shape) > 0.5).astype(jnp.float32)

    loss = jax.block_until_ready(binary_cross_entropy_loss_2d(probs, targets))
    ref = jax.block_until_ready(_reference_bce(probs, targets))
    assert jnp.allclose(loss, ref, atol=1e-5, rtol=1e-5), (loss, ref)

    print("KERNEL_OK")
</pallas_src>

<mosaic_0001>
module attributes {stable_mosaic.version = 11 : i64} {
  func.func @kernel(%arg0: i32, %arg1: i32, %arg2: memref<16x128xf32, #tpu.memory_space<vmem>>, %arg3: memref<16x128xf32, #tpu.memory_space<vmem>>, %arg4: memref<1x8x128xf32, #tpu.memory_space<vmem>>, %arg5: memref<8x128xf32, #tpu.memory_space<vmem>>) attributes {dimension_semantics = [#tpu.dimension_semantics<arbitrary>, #tpu.dimension_semantics<arbitrary>], iteration_bounds = array<i64: 1, 1>, scalar_prefetch = 0 : i64, scratch_operands = 1 : i64, tpu.core_type = #tpu.core_type<tc>, window_params = [{transform_indices = @transform_0, window_bounds = array<i64: 16, 128>}, {transform_indices = @transform_1, window_bounds = array<i64: 16, 128>}, {transform_indices = @transform_2, window_bounds = array<i64: 1, 8, 128>}]} {
    %c0_i32 = arith.constant 0 : i32
    %0 = arith.cmpi eq, %arg1, %c0_i32 : i32
    %1 = arith.extui %0 : i1 to i32
    %c0_i32_0 = arith.constant 0 : i32
    %2 = arith.cmpi ne, %1, %c0_i32_0 : i32
    scf.if %2 {
      %cst = arith.constant 0.000000e+00 : f32
      %16 = vector.broadcast %cst : f32 to vector<8x128xf32>
      %c0 = arith.constant 0 : index
      %c0_7 = arith.constant 0 : index
      %17 = vector.load %arg5[%c0, %c0_7] : memref<8x128xf32, #tpu.memory_space<vmem>>, vector<8x128xf32>
      tpu.vector_store %arg5[%c0, %c0_7], %16 {strides = array<i32>} : memref<8x128xf32, #tpu.memory_space<vmem>>, vector<8x128xf32>,
    } else {
    }
    %c1_i32 = arith.constant 1 : i32
    %3 = arith.muli %arg0, %c1_i32 : i32
    %4 = arith.addi %3, %arg1 : i32
    %c16_i32 = arith.constant 16 : i32
    %5 = arith.muli %4, %c16_i32 : i32
    %c16_i32_1 = arith.constant 16 : i32
    %6 = arith.addi %5, %c16_i32_1 : i32
    %c16_i32_2 = arith.constant 16 : i32
    %7 = arith.cmpi sle, %6, %c16_i32_2 : i32
    %8 = arith.extui %7 : i1 to i32
    %c0_i32_3 = arith.constant 0 : i32
    %9 = arith.cmpi ne, %8, %c0_i32_3 : i32
    scf.if %9 {
      %c0_i32_7 = arith.constant 0 : i32
      %c16_i32_8 = arith.constant 16 : i32
      %16 = arith.muli %c0_i32_7, %c16_i32_8 : i32
      %17 = tpu.assume_multiple %16, 16 : i32
      %18 = arith.index_cast %17 : i32 to index
      %c0 = arith.constant 0 : index
      %19 = vector.load %arg2[%18, %c0] : memref<16x128xf32, #tpu.memory_space<vmem>>, vector<16x128xf32>
      %20 = arith.index_cast %17 : i32 to index
      %c0_9 = arith.constant 0 : index
      %21 = vector.load %arg3[%20, %c0_9] : memref<16x128xf32, #tpu.memory_space<vmem>>, vector<16x128xf32>
      %22 = math.log %19 : vector<16x128xf32>
      %cst = arith.constant -1.000000e+02 : f32
      %23 = vector.broadcast %cst : f32 to vector<16x128xf32>
      %24 = arith.maximumf %22, %23 : vector<16x128xf32>
      %cst_10 = arith.constant 1.000000e+00 : f32
      %25 = vector.broadcast %cst_10 : f32 to vector<16x128xf32>
      %26 = arith.subf %25, %19 : vector<16x128xf32>
      %27 = math.log %26 : vector<16x128xf32>
      %cst_11 = arith.constant -1.000000e+02 : f32
      %28 = vector.broadcast %cst_11 : f32 to vector<16x128xf32>
      %29 = arith.maximumf %27, %28 : vector<16x128xf32>
      %30 = arith.subf %24, %29 : vector<16x128xf32>
      %31 = arith.mulf %21, %30 : vector<16x128xf32>
      %32 = arith.addf %29, %31 : vector<16x128xf32>
      %c0_12 = arith.constant 0 : index
      %c0_13 = arith.constant 0 : index
      %33 = vector.load %arg5[%c0_12, %c0_13] : memref<8x128xf32, #tpu.memory_space<vmem>>, vector<8x128xf32>
      %34 = vector.shape_cast %32 : vector<16x128xf32> to vector<2x8x128xf32>
      %cst_14 = arith.constant dense<0.000000e+00> : vector<8x128xf32>
      %35 = vector.multi_reduction <add>, %34, %cst_14 [0] : vector<2x8x128xf32> to vector<8x128xf32>
      %36 = arith.addf %33, %35 : vector<8x128xf32>
      %c0_15 = arith.constant 0 : index
      %c0_16 = arith.constant 0 : index
      %37 = vector.load %arg5[%c0_15, %c0_16] : memref<8x128xf32, #tpu.memory_space<vmem>>, vector<8x128xf32>
      tpu.vector_store %arg5[%c0_15, %c0_16], %36 {strides = array<i32>} : memref<8x128xf32, #tpu.memory_space<vmem>>, vector<8x128xf32>,
      %c1_i32_17 = arith.constant 1 : i32
    } else {
    }
    %true = arith.constant true
    %10 = arith.xori %7, %true : i1
    %11 = arith.extui %10 : i1 to i32
    %c0_i32_4 = arith.constant 0 : i32
    %12 = arith.cmpi ne, %11, %c0_i32_4 : i32
    scf.if %12 {
      %c0_i32_7 = arith.constant 0 : i32
      %c16_i32_8 = arith.constant 16 : i32
      %16 = arith.muli %c0_i32_7, %c16_i32_8 : i32
      %17 = tpu.assume_multiple %16, 16 : i32
      %18 = arith.index_cast %17 : i32 to index
      %c0 = arith.constant 0 : index
      %19 = vector.load %arg2[%18, %c0] : memref<16x128xf32, #tpu.memory_space<vmem>>, vector<16x128xf32>
      %20 = arith.index_cast %17 : i32 to index
      %c0_9 = arith.constant 0 : index
      %21 = vector.load %arg3[%20, %c0_9] : memref<16x128xf32, #tpu.memory_space<vmem>>, vector<16x128xf32>
      %22 = math.log %19 : vector<16x128xf32>
      %cst = arith.constant -1.000000e+02 : f32
      %23 = vector.broadcast %cst : f32 to vector<16x128xf32>
      %24 = arith.maximumf %22, %23 : vector<16x128xf32>
      %cst_10 = arith.constant 1.000000e+00 : f32
      %25 = vector.broadcast %cst_10 : f32 to vector<16x128xf32>
      %26 = arith.subf %25, %19 : vector<16x128xf32>
      %27 = math.log %26 : vector<16x128xf32>
      %cst_11 = arith.constant -1.000000e+02 : f32
      %28 = vector.broadcast %cst_11 : f32 to vector<16x128xf32>
      %29 = arith.maximumf %27, %28 : vector<16x128xf32>
      %30 = arith.subf %24, %29 : vector<16x128xf32>
      %31 = arith.mulf %21, %30 : vector<16x128xf32>
      %32 = arith.addf %29, %31 : vector<16x128xf32>
      %33 = arith.addi %5, %17 : i32
      %34 = tpu.iota {dimensions = array<i32: 0>} : vector<16x128xi32>
      %35 = vector.broadcast %33 : i32 to vector<16x128xi32>
      %36 = arith.addi %35, %34 : vector<16x128xi32>
      %c16_i32_12 = arith.constant 16 : i32
      %37 = vector.broadcast %c16_i32_12 : i32 to vector<16x128xi32>
      %38 = arith.cmpi slt, %36, %37 : vector<16x128xi32>
      %cst_13 = arith.constant 0.000000e+00 : f32
      %39 = vector.broadcast %cst_13 : f32 to vector<16x128xf32>
      %40 = arith.select %38, %32, %39 : vector<16x128xi1>, vector<16x128xf32>
      %c0_14 = arith.constant 0 : index
      %c0_15 = arith.constant 0 : index
      %41 = vector.load %arg5[%c0_14, %c0_15] : memref<8x128xf32, #tpu.memory_space<vmem>>, vector<8x128xf32>
      %42 = vector.shape_cast %40 : vector<16x128xf32> to vector<2x8x128xf32>
      %cst_16 = arith.constant dense<0.000000e+00> : vector<8x128xf32>
      %43 = vector.multi_reduction <add>, %42, %cst_16 [0] : vector<2x8x128xf32> to vector<8x128xf32>
      %44 = arith.addf %41, %43 : vector<8x128xf32>
      %c0_17 = arith.constant 0 : index
      %c0_18 = arith.constant 0 : index
      %45 = vector.load %arg5[%c0_17, %c0_18] : memref<8x128xf32, #tpu.memory_space<vmem>>, vector<8x128xf32>
      tpu.vector_store %arg5[%c0_17, %c0_18], %44 {strides = array<i32>} : memref<8x128xf32, #tpu.memory_space<vmem>>, vector<8x128xf32>,
      %c1_i32_19 = arith.constant 1 : i32
    } else {
    }
    %c0_i32_5 = arith.constant 0 : i32
    %13 = arith.cmpi eq, %arg1, %c0_i32_5 : i32
    %14 = arith.extui %13 : i1 to i32
    %c0_i32_6 = arith.constant 0 : i32
    %15 = arith.cmpi ne, %14, %c0_i32_6 : i32
    scf.if %15 {
      %c0 = arith.constant 0 : index
      %c0_7 = arith.constant 0 : index
      %16 = vector.load %arg5[%c0, %c0_7] : memref<8x128xf32, #tpu.memory_space<vmem>>, vector<8x128xf32>
      %cst = arith.constant -4.8828125E-4 : f32
      %17 = vector.broadcast %cst : f32 to vector<8x128xf32>
      %18 = arith.mulf %16, %17 : vector<8x128xf32>
      %c0_8 = arith.constant 0 : index
      %c0_9 = arith.constant 0 : index
      %c0_10 = arith.constant 0 : index
      %19 = vector.load %arg4[%c0_8, %c0_9, %c0_10] : memref<1x8x128xf32, #tpu.memory_space<vmem>>, vector<1x8x128xf32>
      %20 = vector.shape_cast %19 : vector<1x8x128xf32> to vector<8x128xf32>
      %21 = vector.shape_cast %18 : vector<8x128xf32> to vector<1x8x128xf32>
      tpu.vector_store %arg4[%c0_8, %c0_9, %c0_10], %21 {strides = array<i32>} : memref<1x8x128xf32, #tpu.memory_space<vmem>>, vector<1x8x128xf32>,
    } else {
    }
    return
  }
  func.func @transform_0(%arg0: i32, %arg1: i32) -> (i32, i32) {
    %c1_i32 = arith.constant 1 : i32
    %0 = arith.muli %arg0, %c1_i32 : i32
    %1 = arith.addi %0, %arg1 : i32
    %c0_i32 = arith.constant 0 : i32
    %2 = arith.minsi %1, %c0_i32 : i32
    %c0_i32_0 = arith.constant 0 : i32
    %c0_i32_1 = arith.constant 0 : i32
    return %2, %c0_i32_0 : i32, i32
  }
  func.func @transform_1(%arg0: i32, %arg1: i32) -> (i32, i32) {
    %c1_i32 = arith.constant 1 : i32
    %0 = arith.muli %arg0, %c1_i32 : i32
    %1 = arith.addi %0, %arg1 : i32
    %c0_i32 = arith.constant 0 : i32
    %2 = arith.minsi %1, %c0_i32 : i32
    %c0_i32_0 = arith.constant 0 : i32
    %c0_i32_1 = arith.constant 0 : i32
    return %2, %c0_i32_0 : i32, i32
  }
  func.func @transform_2(%arg0: i32, %arg1: i32) -> (i32, i32, i32) {
    %c0_i32 = arith.constant 0 : i32
    %c0_i32_0 = arith.constant 0 : i32
    %c0_i32_1 = arith.constant 0 : i32
    return %arg0, %c0_i32, %c0_i32_0 : i32, i32, i32
  }
}

</mosaic_0001>

<bundles_post_ra>
// kernel: tpu_custom_call.1
= control target key start
LH: loop header
LB: loop body
LE: loop exit
PB: predicated region body
PF: predicated region fallthrough
CT: control target
= control target key end

     0   :  { %7 = vsyncpa [#allocation4], 0  ;;  %s295_s0 = inlined_call_operand.hbm [shape: f32[16,128], index: 0, kind: input, shape index: {}]   ;;  %s296_s1 = inlined_call_operand.hbm [shape: f32[16,128], index: 1, kind: input, shape index: {}]   ;;  %s297_s2 = inlined_call_operand.hbm [shape: f32[1,8,128], index: 2, kind: output, shape index: {}]  }
   0x1   :  { %8 = vsyncpa [#allocation7], 0 }
   0x2   :  { %9 = vsyncpa [#allocation5], 0  ;;  %s20_s11 = sshll.u32 %s295_s0, 4  ;;  %s266_s12 = smov [#allocation3]   ;;  %s21_s11 = int_to_ptr.hbm [resolvable:$true] %s20_s11 }
   0x3   :  { %s22_s13 = sshll.u32 %s266_s12, 4  ;;  %s39_s16 = sshll.u32 %s296_s1, 4  ;;  %s23_s13 = int_to_ptr.vmem [resolvable:$true] %s22_s13  ;;  %s40_s16 = int_to_ptr.hbm [resolvable:$true] %s39_s16 }
   0x4   :  { %s267_s17 = smov 128   ;;  %s268_s18 = smov 8  }
   0x5   :  { %28 = dma.hbm_to_vmem [thread:$0]  %s21_s11, 256, %s23_s13, [#allocation4], %s267_s17, %s267_s17, %s268_s18  }
   0x6   :  { %s269_s19 = smov [#allocation6]  }
   0x7   :  { %s41_s20 = sshll.u32 %s269_s19, 4  ;;  %s42_s20 = int_to_ptr.vmem [resolvable:$true] %s41_s20 }
   0x8   :  { %47 = dma.hbm_to_vmem [thread:$0]  %s40_s16, 256, %s42_s20, [#allocation7], %s267_s17, %s267_s17, %s268_s18  }
   0x9   :  { %260 = dma.done.wait [#allocation4], 256  }
   0xa   :  { %261 = vsyncadd [#allocation4], 4294967040 }
   0xb   :  { %262 = dma.done.wait [#allocation7], 256  }
   0xc   :  { %263 = vsyncadd [#allocation7], 4294967040  ;;  %v76_v0 = vld [vmem:[#allocation3] sm:$0xff]  ;;  %v77_v1 = vld [vmem:[#allocation3 + $0x8] sm:$0xff]  ;;  %s270_s0 = smov [#allocation8]   ;;  %s160_s23 = sshll.u32 %s297_s2, 4  ;;  %s161_s23 = int_to_ptr.hbm [resolvable:$true] %s160_s23 }
   0xd   :  { %180 = vlog2.f32 %v76_v0  ;;  %v86_v2 = vsub.f32 1.0, %v76_v0  ;;  %v87_v3 = vsub.f32 1.0, %v77_v1  ;;  %v78_v15 = vld [vmem:[#allocation6] sm:$0xff]  ;;  %v79_v17 = vld [vmem:[#allocation6 + $0x8] sm:$0xff]  ;;  %s158_s1 = sshll.u32 %s270_s0, 4  ;;  %s159_s1 = int_to_ptr.vmem [resolvable:$true] %s158_s1 }
   0xe   :  { %182 = vlog2.f32 %v77_v1 }
   0xf   :  { %184 = vlog2.f32 %v86_v2 }
  0x10   :  { %186 = vlog2.f32 %v87_v3 }
  0x13   :  { %v181_v4 = vpop.eup %180 }
  0x14   :  { %v183_v5 = vpop.eup %182  ;;  %v81_v6 = vmul.f32 0.6931472, %v181_v4 }
  0x15   :  { %v185_v7 = vpop.eup %184  ;;  %v83_v8 = vmul.f32 0.6931472, %v183_v5 }
  0x16   :  { %v187_v9 = vpop.eup %186  ;;  %v84_v10 = vmax.f32 %v81_v6, -100.0  ;;  %v89_v11 = vmul.f32 0.6931472, %v185_v7 }
  0x17   :  { %v85_v12 = vmax.f32 %v83_v8, -100.0  ;;  %v91_v13 = vmul.f32 0.6931472, %v187_v9 }
  0x18   :  { %v92_v14 = vmax.f32 %v89_v11, -100.0 }
  0x19   :  { %v93_v16 = vmax.f32 %v91_v13, -100.0 }
  0x1a   :  { %v94_v18 = vsub.f32 %v84_v10, %v92_v14 }
  0x1b   :  { %v95_v19 = vsub.f32 %v85_v12, %v93_v16 }
  0x1c   :  { %v96_v20 = vmul.f32 %v94_v18, %v78_v15 }
  0x1d   :  { %v97_v21 = vmul.f32 %v95_v19, %v79_v17 }
  0x1e   :  { %v98_v22 = vadd.f32 %v96_v20, %v92_v14 }
  0x1f   :  { %v99_v23 = vadd.f32 %v97_v21, %v93_v16 }
  0x21   :  { %v101_v24 = vadd.f32 %v99_v23, %v98_v22 }
  0x23   :  { %v151_v25 = vmul.f32 -0.00048828125, %v101_v24 }
  0x25   :  { %152 = vst [vmem:[#allocation8] sm:$0xff] %v151_v25 }
  0x26   :  { %163 = dma.vmem_to_hbm [thread:$0]  %s159_s1, 128, %s161_s23, [#allocation5]  }
  0x27   :  { %264 = dma.done.wait [#allocation5], 128  }
  0x28   :  { %265 = vsyncadd [#allocation5], 4294967168 }
  0x29   :  { %168 = vsyncpa [#allocation4], 1 }
  0x2a   :  { %169 = vsyncpa [#allocation7], 1 }
  0x2b   :  { %170 = vsyncpa [#allocation5], 1 }

</bundles_post_ra>
